<compile_context>
chip_gen: v6e
topology: v6e:2x2x1
jax: 0.10.0
libtpu: 0.0.40
codegen_flags: <defaults>
</compile_context>

<pallas_src>
import jax
import jax.numpy as jnp
from jax import lax
from jax.experimental import pallas as pl
from jax.experimental.pallas import tpu as pltpu


def _copy_kernel(x_ref, o_ref):
    # The chomp already happened via the grid/BlockSpec: just copy the block.
    o_ref[...] = x_ref[...]


def _round_up(v, m):
    return ((v + m - 1) // m) * m


_SMALL_BYTES = 4 << 20  # below this, a plain XLA slice beats kernel-launch cost


def _chip_budgets():
    """Per-block VMEM budget and scoped-VMEM limit, gated on chip VMEM size."""
    vmem_cap = None
    try:
        info = pltpu.get_tpu_info()
        vmem_cap = getattr(info, "vmem_capacity_bytes", None)
    except Exception:
        vmem_cap = None
    if vmem_cap is None:
        vmem_cap = 64 << 20  # conservative default (v7x-sized)
    if vmem_cap <= (64 << 20):
        # v7x-class: 64 MiB physical VMEM.  2 arrays x 2 buffers x 8 MiB = 32 MiB live.
        return 8 << 20, 40 << 20
    # v5e / v6e-class: 128 MiB physical VMEM.  2 x 2 x 16 MiB = 64 MiB live.
    return 16 << 20, 80 << 20


def _choose_tiles(rows, l_out, itemsize, sublane, block_budget):
    """Pick (tile_r, tile_l): lane-dense, budget-driven, >=2 row blocks when splittable."""
    lanes_full = _round_up(l_out, 128)
    # Prefer a single full-width column block (keeps the grid 1-D over rows and
    # every output DMA covering full contiguous output rows).  Only split
    # columns when even `sublane` rows at full width blow the block budget.
    if lanes_full * sublane * itemsize <= block_budget:
        tile_l = lanes_full
    else:
        tile_l = max(128, (block_budget // (sublane * itemsize)) // 128 * 128)
        tile_l = min(tile_l, lanes_full)

    max_rows_by_vmem = max(
        sublane, (block_budget // (tile_l * itemsize)) // sublane * sublane
    )
    tile_r = min(_round_up(rows, sublane), max_rows_by_vmem)
    # Ensure the (parallel) row grid has >= 2 blocks whenever rows is
    # splittable, so both v7x TensorCores get work.  Neutral on v5e/v6e.
    tile_r = min(tile_r, _round_up(pl.cdiv(rows, 2), sublane))
    return tile_r, tile_l


def chomp1d(x: jax.Array, chomp_size: int, *, force_pallas: bool = False) -> jax.Array:
    """Pallas implementation of Chomp1d.forward: x[:, :, :-chomp_size]."""
    n, c, l = x.shape
    if chomp_size == 0:
        # PyTorch's x[:, :, :-0] is an empty slice along the last axis.
        return x[:, :, :0]
    assert 0 < chomp_size < l, "need 0 < chomp_size < L"
    l_out = l - chomp_size

    itemsize = jnp.dtype(x.dtype).itemsize

    # Small-input fast path: kernel launch / pipeline setup dwarfs the copy.
    if not force_pallas and n * c * l_out * itemsize < _SMALL_BYTES:
        return lax.slice(x, (0, 0, 0), (n, c, l_out))

    # Flatten (N, C) -> rows; free reshape for a contiguous NCL array.
    rows = n * c
    x2d = x.reshape(rows, l)

    # Sublane multiple by dtype packing (f32: 8, bf16: 16, int8/fp8: 32).
    sublane = {4: 8, 2: 16, 1: 32}.get(itemsize, 8)

    block_budget, vmem_limit = _chip_budgets()
    tile_r, tile_l = _choose_tiles(rows, l_out, itemsize, sublane, block_budget)

    grid = (pl.cdiv(rows, tile_r), pl.cdiv(l_out, tile_l))

    out2d = pl.pallas_call(
        _copy_kernel,
        out_shape=jax.ShapeDtypeStruct((rows, l_out), x.dtype),
        grid_spec=pltpu.PrefetchScalarGridSpec(
            num_scalar_prefetch=0,
            grid=grid,
            # Input block indexing is identical to the output's: the column
            # grid only covers the first l_out columns, so the chomped tail is
            # never transferred except a clipped partial read in the last
            # column block.  Those padded lanes land in the VMEM block but are
            # never written back (output DMA is clipped to (rows, l_out)).
            in_specs=[pl.BlockSpec((tile_r, tile_l), lambda i, j: (i, j))],
            out_specs=pl.BlockSpec((tile_r, tile_l), lambda i, j: (i, j)),
        ),
        compiler_params=pltpu.CompilerParams(
            dimension_semantics=("parallel", "parallel"),
            vmem_limit_bytes=vmem_limit,
        ),
        cost_estimate=pl.CostEstimate(
            flops=0,
            transcendentals=0,
            bytes_accessed=2 * rows * l_out * itemsize,
        ),
    )(x2d)

    return out2d.reshape(n, c, l_out)


if __name__ == "__main__":
    # Chomp1d has no learnable parameters; only chomp_size from __init__.
    chomp_size = 3

    key = jax.random.PRNGKey(0)
    n, c, l = 2, 4, 16  # (batch, channels, seq_len)
    x = jax.random.normal(key, (n, c, l), dtype=jnp.float32)

    # Force the Pallas path so the kernel itself is exercised at the test size.
    y = jax.block_until_ready(chomp1d(x, chomp_size, force_pallas=True))
    y_ref = x[:, :, :-chomp_size]
    assert y.shape == (n, c, l - chomp_size), y.shape
    assert jnp.array_equal(y, y_ref), "Pallas chomp mismatch vs reference slice"

    # Also exercise the small-input fast path.
    y_fast = jax.block_until_ready(chomp1d(x, chomp_size))
    assert jnp.array_equal(y_fast, y_ref)

    # A larger shape that exercises the tiled / partial-edge path and the
    # >=2-row-block split (rows=384 -> 2 parallel row blocks).
    n2, c2, l2, ch2 = 4, 96, 1000, 7
    xb = jax.random.normal(jax.random.PRNGKey(1), (n2, c2, l2), dtype=jnp.float32)
    yb = jax.block_until_ready(chomp1d(xb, ch2, force_pallas=True))
    assert jnp.array_equal(yb, xb[:, :, :-ch2]), "Pallas chomp mismatch (large shape)"

    # A bf16 shape (sublane=16) with non-multiple rows, to exercise partial
    # row blocks and the dtype-dependent sublane rounding.
    n3, c3, l3, ch3 = 3, 7, 300, 5
    xc = jax.random.normal(jax.random.PRNGKey(2), (n3, c3, l3)).astype(jnp.bfloat16)
    yc = jax.block_until_ready(chomp1d(xc, ch3, force_pallas=True))
    assert jnp.array_equal(yc, xc[:, :, :-ch3]), "Pallas chomp mismatch (bf16 shape)"

    print("KERNEL_OK")
</pallas_src>

<mosaic_0001>
module attributes {stable_mosaic.version = 11 : i64} {
  func.func @_copy_kernel(%arg0: i32, %arg1: i32, %arg2: memref<8x128xf32, #tpu.memory_space<vmem>>, %arg3: memref<8x128xf32, #tpu.memory_space<vmem>>) attributes {dimension_semantics = [#tpu.dimension_semantics<parallel>, #tpu.dimension_semantics<parallel>], iteration_bounds = array<i64: 1, 1>, scalar_prefetch = 0 : i64, scratch_operands = 0 : i64, tpu.core_type = #tpu.core_type<tc>, window_params = [{transform_indices = @transform_0, window_bounds = array<i64: 8, 128>}, {transform_indices = @transform_1, window_bounds = array<i64: 8, 128>}]} {
    %c0 = arith.constant 0 : index
    %c0_0 = arith.constant 0 : index
    %0 = vector.load %arg2[%c0, %c0_0] : memref<8x128xf32, #tpu.memory_space<vmem>>, vector<8x128xf32>
    %c0_1 = arith.constant 0 : index
    %c0_2 = arith.constant 0 : index
    %1 = vector.load %arg3[%c0_1, %c0_2] : memref<8x128xf32, #tpu.memory_space<vmem>>, vector<8x128xf32>
    tpu.vector_store %arg3[%c0_1, %c0_2], %0 {strides = array<i32>} : memref<8x128xf32, #tpu.memory_space<vmem>>, vector<8x128xf32>,
    return
  }
  func.func @transform_0(%arg0: i32, %arg1: i32) -> (i32, i32) {
    %c0_i32 = arith.constant 0 : i32
    return %arg0, %arg1 : i32, i32
  }
  func.func @transform_1(%arg0: i32, %arg1: i32) -> (i32, i32) {
    %c0_i32 = arith.constant 0 : i32
    return %arg0, %arg1 : i32, i32
  }
}

</mosaic_0001>

<bundles_post_ra>
// kernel: tpu_custom_call.1
= control target key start
LH: loop header
LB: loop body
LE: loop exit
PB: predicated region body
PF: predicated region fallthrough
CT: control target
= control target key end

     0   :  { %6 = vsyncpa [#allocation3], 0  ;;  %s102_s0 = inlined_call_operand.hbm [shape: f32[8,16], index: 0, kind: input, shape index: {}]   ;;  %s103_s1 = inlined_call_operand.hbm [shape: f32[8,13], index: 1, kind: output, shape index: {}]  }
   0x1   :  { %7 = vsyncpa [#allocation4], 0  ;;  %s84_s6 = smov [#allocation2]  }
   0x2   :  { %s14_s7 = sshll.u32 %s84_s6, 4  ;;  %s15_s7 = int_to_ptr.vmem [resolvable:$true] %s14_s7 }
   0x3   :  { %s48_s8 = scalar_lea.vmem %s15_s7, 128  ;;  %p53_p1 = scmp.lt.s32.totalorder %s15_s7, %s15_s7 }
   0x4   :  { %p49_p0 = scmp.ne.s32.totalorder %s15_s7, %s48_s8  ;;  %p54_p2 = scmp.lt.s32.totalorder %s48_s8, %s48_s8 }
   0x6   :  { %p55_p3 = por %p54_p2, %p53_p1 }
   0x8   :  { %p56_p4 = pnand %p55_p3, %p49_p0 }
   0xa   :  { %59 = shalt.err (!%p56_p4)
}
   0xb   :  { %17 = dma.hbm_to_vmem [thread:$0]  %s102_s0, 128, %s15_s7, [#allocation3]  }
   0xc   :  { %80 = dma.done.wait [#allocation3], 128  }
   0xd   :  { %81 = vsyncadd [#allocation3], 4294967168  ;;  %s85_s11 = smov [#allocation5]   ;;  %v21_v0 = vld [vmem:[#allocation2] sm:$0xff] }
   0xe   :  { %s29_s12 = sshll.u32 %s85_s11, 4  ;;  %22 = vst [vmem:[#allocation5] sm:$0xff] %v21_v0  ;;  %s30_s12 = int_to_ptr.vmem [resolvable:$true] %s29_s12 }
   0xf   :  { %s60_s13 = scalar_lea.vmem %s30_s12, 128  ;;  %p65_p6 = scmp.lt.s32.totalorder %s30_s12, %s30_s12 }
  0x10   :  { %p61_p5 = scmp.ne.s32.totalorder %s30_s12, %s60_s13  ;;  %p66_p7 = scmp.lt.s32.totalorder %s60_s13, %s60_s13 }
  0x12   :  { %p67_p8 = por %p66_p7, %p65_p6 }
  0x14   :  { %p68_p9 = pnand %p67_p8, %p61_p5 }
  0x16   :  { %71 = shalt.err (!%p68_p9)
}
  0x17   :  { %32 = dma.vmem_to_hbm [thread:$0]  %s30_s12, 128, %s103_s1, [#allocation4]  }
  0x18   :  { %82 = dma.done.wait [#allocation4], 128  }
  0x19   :  { %83 = vsyncadd [#allocation4], 4294967168 }
  0x1a   :  { %36 = vsyncpa [#allocation3], 1 }
  0x1b   :  { %37 = vsyncpa [#allocation4], 1 }

</bundles_post_ra>
